<compile_context>
chip_gen: v6e
topology: v6e:2x2x1
jax: 0.10.0
libtpu: 0.0.40
codegen_flags: <defaults>
</compile_context>

<pallas_src>
import jax
import jax.numpy as jnp
from jax.experimental import pallas as pl
from jax.experimental.pallas import tpu as pltpu

EPS = 1e-5


def _bn_kernel(x_ref, gamma_ref, beta_ref, o_ref):
    # x_ref:    (N, c_tile, HW) f32 in VMEM (channels on sublanes, HW on lanes)
    # gamma_ref, beta_ref: (1, c_tile, 1) f32
    n, _, hw = x_ref.shape
    r_inv = jnp.float32(1.0 / (n * hw))

    # Pass 1: per-channel mean.
    mean = jnp.sum(x_ref[...], axis=(0, 2), keepdims=True) * r_inv  # (1,c,1)

    # Pass 2: centered sum of squares (avoids E[x^2] - mean^2 cancellation).
    d = x_ref[...] - mean
    var = jnp.sum(d * d, axis=(0, 2), keepdims=True) * r_inv        # (1,c,1)

    inv_std = jax.lax.rsqrt(var + EPS)
    scale = gamma_ref[...] * inv_std                                 # (1,c,1)
    bias = beta_ref[...] - mean * scale                              # (1,c,1)

    # Pass 3: y = x*scale + bias  (1 mul + 1 add + 1 store per element).
    o_ref[...] = (x_ref[...] * scale + bias).astype(o_ref.dtype)


def _pick_c_tile(c):
    # Largest multiple of 8 that divides C, capped at 160 so there are >= 2
    # tiles for C >= 320 (megacore on v7x) and pipelining has work to overlap.
    for cand in (160, 128, 80, 64, 40, 32, 16, 8):
        if c % cand == 0:
            return cand
    return c  # fallback: single whole-C tile


def batchnorm2d(x_nchw, gamma, beta):
    """BatchNorm2d forward with batch statistics (training-mode math).

    x_nchw: (N, C, H, W) float32
    gamma, beta: (C,) float32
    returns: (N, C, H, W) float32
    """
    n, c, h, w = x_nchw.shape
    hw = h * w

    c_tile = _pick_c_tile(c)
    n_tiles = c // c_tile

    # Contiguous reshape only (no data movement): NCHW -> (N, C, H*W).
    x3d = x_nchw.reshape(n, c, hw)
    gamma3d = gamma.reshape(1, c, 1)
    beta3d = beta.reshape(1, c, 1)

    out3d = pl.pallas_call(
        _bn_kernel,
        out_shape=jax.ShapeDtypeStruct((n, c, hw), x_nchw.dtype),
        grid_spec=pltpu.PrefetchScalarGridSpec(
            num_scalar_prefetch=0,
            grid=(n_tiles,),
            in_specs=[
                pl.BlockSpec((n, c_tile, hw), lambda i: (0, i, 0)),
                pl.BlockSpec((1, c_tile, 1), lambda i: (0, i, 0)),
                pl.BlockSpec((1, c_tile, 1), lambda i: (0, i, 0)),
            ],
            out_specs=pl.BlockSpec((n, c_tile, hw), lambda i: (0, i, 0)),
        ),
        compiler_params=pltpu.CompilerParams(
            # Channel tiles are fully independent -> parallel (megacore on v7x).
            dimension_semantics=("parallel",),
        ),
    )(x3d, gamma3d, beta3d)

    # Contiguous reshape back: (N, C, H*W) -> NCHW.
    return out3d.reshape(n, c, h, w)


def _reference(x_nchw, gamma, beta):
    mean = jnp.mean(x_nchw, axis=(0, 2, 3), keepdims=True)
    var = jnp.mean((x_nchw - mean) ** 2, axis=(0, 2, 3), keepdims=True)
    g = gamma.reshape(1, -1, 1, 1)
    b = beta.reshape(1, -1, 1, 1)
    return (x_nchw - mean) * jax.lax.rsqrt(var + EPS) * g + b


if __name__ == "__main__":
    key = jax.random.PRNGKey(0)
    kx, kg, kb = jax.random.split(key, 3)

    N, C, H, W = 1, 320, 14, 14  # matches the module's BatchNorm2d(320)
    x = jax.random.normal(kx, (N, C, H, W), dtype=jnp.float32)
    # PyTorch default init is weight=1, bias=0; perturb deterministically so
    # the affine path is actually exercised.
    gamma = 1.0 + 0.1 * jax.random.normal(kg, (C,), dtype=jnp.float32)
    beta = 0.1 * jax.random.normal(kb, (C,), dtype=jnp.float32)

    out = batchnorm2d(x, gamma, beta)
    out = jax.block_until_ready(out)

    ref = _reference(x, gamma, beta)
    assert out.shape == (N, C, H, W)
    assert jnp.max(jnp.abs(out - ref)) < 1e-4, "mismatch vs reference"

    print("KERNEL_OK")
</pallas_src>

<mosaic_0001>
module attributes {stable_mosaic.version = 11 : i64} {
  func.func @_bn_kernel(%arg0: i32, %arg1: memref<1x160x196xf32, #tpu.memory_space<vmem>>, %arg2: memref<1x160x1xf32, #tpu.memory_space<vmem>>, %arg3: memref<1x160x1xf32, #tpu.memory_space<vmem>>, %arg4: memref<1x160x196xf32, #tpu.memory_space<vmem>>) attributes {dimension_semantics = [#tpu.dimension_semantics<parallel>], iteration_bounds = array<i64: 2>, scalar_prefetch = 0 : i64, scratch_operands = 0 : i64, tpu.core_type = #tpu.core_type<tc>, window_params = [{transform_indices = @transform_0, window_bounds = array<i64: 1, 160, 196>}, {transform_indices = @transform_1, window_bounds = array<i64: 1, 160, 1>}, {transform_indices = @transform_2, window_bounds = array<i64: 1, 160, 1>}, {transform_indices = @transform_3, window_bounds = array<i64: 1, 160, 196>}]} {
    %c0 = arith.constant 0 : index
    %c0_0 = arith.constant 0 : index
    %c0_1 = arith.constant 0 : index
    %0 = vector.load %arg1[%c0, %c0_0, %c0_1] : memref<1x160x196xf32, #tpu.memory_space<vmem>>, vector<1x160x196xf32>
    %cst = arith.constant dense<0.000000e+00> : vector<160xf32>
    %1 = vector.multi_reduction <add>, %0, %cst [0, 2] : vector<1x160x196xf32> to vector<160xf32>
    %2 = vector.shape_cast %1 : vector<160xf32> to vector<1x160x1xf32>
    %cst_2 = arith.constant 0.00510204071 : f32
    %3 = vector.broadcast %cst_2 : f32 to vector<1x160x1xf32>
    %4 = arith.mulf %2, %3 : vector<1x160x1xf32>
    %c0_3 = arith.constant 0 : index
    %c0_4 = arith.constant 0 : index
    %c0_5 = arith.constant 0 : index
    %5 = vector.load %arg1[%c0_3, %c0_4, %c0_5] : memref<1x160x196xf32, #tpu.memory_space<vmem>>, vector<1x160x196xf32>
    %6 = vector.broadcast %4 : vector<1x160x1xf32> to vector<1x160x196xf32>
    %7 = arith.subf %5, %6 : vector<1x160x196xf32>
    %8 = arith.mulf %7, %7 : vector<1x160x196xf32>
    %cst_6 = arith.constant dense<0.000000e+00> : vector<160xf32>
    %9 = vector.multi_reduction <add>, %8, %cst_6 [0, 2] : vector<1x160x196xf32> to vector<160xf32>
    %10 = vector.shape_cast %9 : vector<160xf32> to vector<1x160x1xf32>
    %cst_7 = arith.constant 0.00510204071 : f32
    %11 = vector.broadcast %cst_7 : f32 to vector<1x160x1xf32>
    %12 = arith.mulf %10, %11 : vector<1x160x1xf32>
    %cst_8 = arith.constant 9.99999974E-6 : f32
    %13 = vector.broadcast %cst_8 : f32 to vector<1x160x1xf32>
    %14 = arith.addf %12, %13 : vector<1x160x1xf32>
    %15 = math.rsqrt %14 : vector<1x160x1xf32>
    %c0_9 = arith.constant 0 : index
    %c0_10 = arith.constant 0 : index
    %c0_11 = arith.constant 0 : index
    %16 = vector.load %arg2[%c0_9, %c0_10, %c0_11] : memref<1x160x1xf32, #tpu.memory_space<vmem>>, vector<1x160x1xf32>
    %17 = arith.mulf %16, %15 : vector<1x160x1xf32>
    %c0_12 = arith.constant 0 : index
    %c0_13 = arith.constant 0 : index
    %c0_14 = arith.constant 0 : index
    %18 = vector.load %arg3[%c0_12, %c0_13, %c0_14] : memref<1x160x1xf32, #tpu.memory_space<vmem>>, vector<1x160x1xf32>
    %19 = arith.mulf %4, %17 : vector<1x160x1xf32>
    %20 = arith.subf %18, %19 : vector<1x160x1xf32>
    %c0_15 = arith.constant 0 : index
    %c0_16 = arith.constant 0 : index
    %c0_17 = arith.constant 0 : index
    %21 = vector.load %arg1[%c0_15, %c0_16, %c0_17] : memref<1x160x196xf32, #tpu.memory_space<vmem>>, vector<1x160x196xf32>
    %22 = vector.broadcast %17 : vector<1x160x1xf32> to vector<1x160x196xf32>
    %23 = arith.mulf %21, %22 : vector<1x160x196xf32>
    %24 = vector.broadcast %20 : vector<1x160x1xf32> to vector<1x160x196xf32>
    %25 = arith.addf %23, %24 : vector<1x160x196xf32>
    %c0_18 = arith.constant 0 : index
    %c0_19 = arith.constant 0 : index
    %c0_20 = arith.constant 0 : index
    %26 = vector.load %arg4[%c0_18, %c0_19, %c0_20] : memref<1x160x196xf32, #tpu.memory_space<vmem>>, vector<1x160x196xf32>
    tpu.vector_store %arg4[%c0_18, %c0_19, %c0_20], %25 {strides = array<i32>} : memref<1x160x196xf32, #tpu.memory_space<vmem>>, vector<1x160x196xf32>,
    return
  }
  func.func @transform_0(%arg0: i32) -> (i32, i32, i32) {
    %c0_i32 = arith.constant 0 : i32
    %c0_i32_0 = arith.constant 0 : i32
    %c0_i32_1 = arith.constant 0 : i32
    return %c0_i32, %arg0, %c0_i32_0 : i32, i32, i32
  }
  func.func @transform_1(%arg0: i32) -> (i32, i32, i32) {
    %c0_i32 = arith.constant 0 : i32
    %c0_i32_0 = arith.constant 0 : i32
    %c0_i32_1 = arith.constant 0 : i32
    return %c0_i32, %arg0, %c0_i32_0 : i32, i32, i32
  }
  func.func @transform_2(%arg0: i32) -> (i32, i32, i32) {
    %c0_i32 = arith.constant 0 : i32
    %c0_i32_0 = arith.constant 0 : i32
    %c0_i32_1 = arith.constant 0 : i32
    return %c0_i32, %arg0, %c0_i32_0 : i32, i32, i32
  }
  func.func @transform_3(%arg0: i32) -> (i32, i32, i32) {
    %c0_i32 = arith.constant 0 : i32
    %c0_i32_0 = arith.constant 0 : i32
    %c0_i32_1 = arith.constant 0 : i32
    return %c0_i32, %arg0, %c0_i32_0 : i32, i32, i32
  }
}

</mosaic_0001>

<bundles_post_ra>
// kernel: tpu_custom_call.1
= control target key start
LH: loop header
LB: loop body
LE: loop exit
PB: predicated region body
PF: predicated region fallthrough
CT: control target
= control target key end

     0   :  { %s1221_s12 = smov 0   ;;  %s1880_s0 = inlined_call_operand.vmem [shape: f32[1,320,196], index: 0, kind: input, shape index: {}]   ;;  %s1881_s1 = inlined_call_operand.vmem [shape: f32[1,320,1], index: 1, kind: input, shape index: {}]   ;;  %s1882_s2 = inlined_call_operand.vmem [shape: f32[1,320,1], index: 2, kind: input, shape index: {}]   ;;  %s1883_s3 = inlined_call_operand.vmem [shape: f32[1,320,196], index: 3, kind: output, shape index: {}]  }
   0x1 LB: > { %s1086_s13 = sadd.s32 4294967295, %s1198_s12   ;;  %p1090_p0 = scmp.ge.s32.totalorder %s1198_s12, 1  ;;  %s1198_s12 = sphi %s1221_s12, %s13_s12  }
   0x2   : > { %p161_p1 = scmp.lt.s32.totalorder %s1198_s12, 3 }
   0x4   : > { %p162_p2 = pnand %p1090_p0, %p161_p1 }
   0x5   : > { %s197_s14 = smul.u32 (!%p162_p2), 20, %s1086_s13 }
   0x6   : > { %165 = sbr.rel (%p162_p2) target bundleno = 542 (0x21e), region = 32 }
   0x7   : > { %p198_p3 = scmp.lt.s32.totalorder (!%p162_p2), %s197_s14, 39 }
   0xb   : > { %s1885_s14 = smov (!%p198_p3, %s197_s14), 39  ;;  %vm263_vm0 = vcmask 556032  }
   0xc   : > { %s1099_s15 = sshll.u32 %s1885_s14, 4  ;;  %s1093_s19 = sshll.u32 %s1885_s14, 3 }
   0xd   : > { %s1237_s18 = scalar_lea.vmem %s1880_s0, %s1099_s15  ;;  %s1565_s22 = scalar_lea.vmem %s1881_s1, %s1093_s19 }
   0xe   : > { %v1240_v0 = vld [vmem:[%s1237_s18] sm:$0xff]  ;;  %v1243_v1 = vld [vmem:[%s1237_s18 + $0x8] sm:$0xff]  ;;  %v1254_v5 = vld [vmem:[%s1237_s18 + $0x10] sm:$0xff]  ;;  %s1635_s25 = scalar_lea.vmem %s1882_s2, %s1093_s19  ;;  %s1743_s28 = scalar_lea.vmem %s1883_s3, %s1099_s15 }
   0xf   : > { %v1246_v2 = vld [vmem:[%s1237_s18 + $0x20] sm:$0xff]  ;;  %v264_v3 = vsel %vm263_vm0, %v1243_v1, 0.0  ;;  %v1251_v4 = vld [vmem:[%s1237_s18 + $0x28] sm:$0xff]  ;;  %v1257_v6 = vld [vmem:[%s1237_s18 + $0x18] sm:$0xff] }
  0x10   : > { %v265_v7 = vadd.f32 %v264_v3, %v1240_v0  ;;  %v272_v8 = vsel %vm263_vm0, %v1251_v4, 0.0  ;;  %v268_v9 = vsel %vm263_vm0, %v1257_v6, 0.0  ;;  %v1265_v10 = vld [vmem:[%s1237_s18 + $0x30] sm:$0xff]  ;;  %v1268_v11 = vld [vmem:[%s1237_s18 + $0x38] sm:$0xff]  ;;  %v1274_v14 = vld [vmem:[%s1237_s18 + $0x48] sm:$0xff] }
  0x11   : > { %v273_v12 = vadd.f32 %v272_v8, %v1246_v2  ;;  %v276_v13 = vsel %vm263_vm0, %v1268_v11, 0.0  ;;  %v1277_v15 = vld [vmem:[%s1237_s18 + $0x58] sm:$0xff]  ;;  %v269_v16 = vadd.f32 %v268_v9, %v1254_v5  ;;  %v1282_v18 = vld [vmem:[%s1237_s18 + $0x40] sm:$0xff]  ;;  %v280_v19 = vsel %vm263_vm0, %v1274_v14, 0.0  ;;  %v1287_v20 = vld [vmem:[%s1237_s18 + $0x50] sm:$0xff] }
  0x12   : > { %266 = vadd.xlane.f32.xlu0 %v265_v7  ;;  %v277_v17 = vadd.f32 %v276_v13, %v1265_v10  ;;  %v284_v21 = vsel %vm263_vm0, %v1277_v15, 0.0  ;;  %v1292_v22 = vld [vmem:[%s1237_s18 + $0x68] sm:$0xff]  ;;  %v1295_v23 = vld [vmem:[%s1237_s18 + $0x78] sm:$0xff]  ;;  %v281_v24 = vadd.f32 %v280_v19, %v1282_v18  ;;  %v1300_v26 = vld [vmem:[%s1237_s18 + $0x60] sm:$0xff] }
  0x13   : > { %274 = vadd.xlane.f32.xlu1 %v273_v12  ;;  %v285_v25 = vadd.f32 %v284_v21, %v1287_v20  ;;  %v288_v27 = vsel %vm263_vm0, %v1292_v22, 0.0  ;;  %v1305_v28 = vld [vmem:[%s1237_s18 + $0x70] sm:$0xff]  ;;  %v292_v29 = vsel %vm263_vm0, %v1295_v23, 0.0  ;;  %v1310_v30 = vld [vmem:[%s1237_s18 + $0x88] sm:$0xff]  ;;  %v1313_v31 = vld [vmem:[%s1237_s18 + $0x98] sm:$0xff] }
  0x14   : > { %v289_v32 = vadd.f32 %v288_v27, %v1300_v26  ;;  %v293_v33 = vadd.f32 %v292_v29, %v1305_v28  ;;  %v1318_v34 = vld [vmem:[%s1237_s18 + $0x80] sm:$0xff]  ;;  %v296_v35 = vsel %vm263_vm0, %v1310_v30, 0.0  ;;  %v1323_v36 = vld [vmem:[%s1237_s18 + $0x90] sm:$0xff]  ;;  %v300_v37 = vsel %vm263_vm0, %v1313_v31, 0.0  ;;  %v1328_v38 = vld [vmem:[%s1237_s18 + $0xa8] sm:$0xff] }
  0x15   : > { %v1331_v39 = vld [vmem:[%s1237_s18 + $0xb8] sm:$0xff]  ;;  %v297_v40 = vadd.f32 %v296_v35, %v1318_v34  ;;  %v301_v41 = vadd.f32 %v300_v37, %v1323_v36  ;;  %v1336_v42 = vld [vmem:[%s1237_s18 + $0xa0] sm:$0xff]  ;;  %v304_v43 = vsel %vm263_vm0, %v1328_v38, 0.0  ;;  %v1341_v44 = vld [vmem:[%s1237_s18 + $0xb0] sm:$0xff] }
  0x16   : > { %270 = vadd.xlane.f32.xlu0 %v269_v16  ;;  %v308_v45 = vsel %vm263_vm0, %v1331_v39, 0.0  ;;  %v1346_v46 = vld [vmem:[%s1237_s18 + $0xc8] sm:$0xff]  ;;  %v1349_v47 = vld [vmem:[%s1237_s18 + $0xd8] sm:$0xff]  ;;  %v305_v48 = vadd.f32 %v304_v43, %v1336_v42  ;;  %v1354_v50 = vld [vmem:[%s1237_s18 + $0xc0] sm:$0xff] }
  0x17   : > { %278 = vadd.xlane.f32.xlu1 %v277_v17  ;;  %v309_v49 = vadd.f32 %v308_v45, %v1341_v44  ;;  %v312_v51 = vsel %vm263_vm0, %v1346_v46, 0.0  ;;  %v1359_v52 = vld [vmem:[%s1237_s18 + $0xd0] sm:$0xff]  ;;  %v316_v53 = vsel %vm263_vm0, %v1349_v47, 0.0  ;;  %v1364_v54 = vld [vmem:[%s1237_s18 + $0xe8] sm:$0xff]  ;;  %v1367_v55 = vld [vmem:[%s1237_s18 + $0xf8] sm:$0xff] }
  0x18   : > { %v313_v56 = vadd.f32 %v312_v51, %v1354_v50  ;;  %v317_v57 = vadd.f32 %v316_v53, %v1359_v52  ;;  %v1372_v58 = vld [vmem:[%s1237_s18 + $0xe0] sm:$0xff]  ;;  %v320_v59 = vsel %vm263_vm0, %v1364_v54, 0.0  ;;  %v1377_v60 = vld [vmem:[%s1237_s18 + $0xf0] sm:$0xff]  ;;  %v324_v61 = vsel %vm263_vm0, %v1367_v55, 0.0  ;;  %v1382_v62 = vld [vmem:[%s1237_s18 + $0x108] sm:$0xff] }
  0x19   : > { %v1385_v63 = vld [vmem:[%s1237_s18 + $0x118] sm:$0xff]  ;;  %v321_v3 = vadd.f32 %v320_v59, %v1372_v58  ;;  %v325_v7 = vadd.f32 %v324_v61, %v1377_v60  ;;  %v1390_v8 = vld [vmem:[%s1237_s18 + $0x100] sm:$0xff]  ;;  %v328_v9 = vsel %vm263_vm0, %v1382_v62, 0.0  ;;  %v1395_v12 = vld [vmem:[%s1237_s18 + $0x110] sm:$0xff] }
  0x1a   : > { %282 = vadd.xlane.f32.xlu0 %v281_v24  ;;  %v332_v13 = vsel %vm263_vm0, %v1385_v63, 0.0  ;;  %v1400_v16 = vld [vmem:[%s1237_s18 + $0x128] sm:$0xff]  ;;  %v1403_v17 = vld [vmem:[%s1237_s18 + $0x138] sm:$0xff]  ;;  %v329_v19 = vadd.f32 %v328_v9, %v1390_v8  ;;  %v1408_v24 = vld [vmem:[%s1237_s18 + $0x120] sm:$0xff] }
  0x1b   : > { %286 = vadd.xlane.f32.xlu1 %v285_v25  ;;  %v333_v21 = vadd.f32 %v332_v13, %v1395_v12  ;;  %v336_v25 = vsel %vm263_vm0, %v1400_v16, 0.0  ;;  %v1413_v27 = vld [vmem:[%s1237_s18 + $0x130] sm:$0xff]  ;;  %v340_v29 = vsel %vm263_vm0, %v1403_v17, 0.0 }
  0x1e   : > { %290 = vadd.xlane.f32.xlu0 %v289_v32  ;;  %v337_v32 = vadd.f32 %v336_v25, %v1408_v24 }
  0x1f   : > { %294 = vadd.xlane.f32.xlu1 %v293_v33  ;;  %v341_v33 = vadd.f32 %v340_v29, %v1413_v27 }
  0x22   : > { %298 = vadd.xlane.f32.xlu0 %v297_v40 }
  0x23   : > { %302 = vadd.xlane.f32.xlu1 %v301_v41 }
  0x26   : > { %306 = vadd.xlane.f32.xlu0 %v305_v48 }
  0x27   : > { %310 = vadd.xlane.f32.xlu1 %v309_v49 }
  0x2a   : > { %314 = vadd.xlane.f32.xlu0 %v313_v56 }
  0x2b   : > { %318 = vadd.xlane.f32.xlu1 %v317_v57 }
  0x2e   : > { %322 = vadd.xlane.f32.xlu0 %v321_v3 }
  0x2f   : > { %326 = vadd.xlane.f32.xlu1 %v325_v7 }
  0x32   : > { %330 = vadd.xlane.f32.xlu0 %v329_v19 }
  0x33   : > { %334 = vadd.xlane.f32.xlu1 %v333_v21 }
  0x36   : > { %338 = vadd.xlane.f32.xlu0 %v337_v32 }
  0x37   : > { %342 = vadd.xlane.f32.xlu1 %v341_v33 }
  0x9b   : > { %v267_v35 = vpop.xlane.xlu0 %266 }
  0x9c   : > { %v1419_v37 = vmul.f32 0.0051020407, %v267_v35  ;;  %v275_v40 = vpop.xlane.xlu1 %274 }
  0x9d   : > { %v1421_v41 = vmul.f32 0.0051020407, %v275_v40 }
  0x9e   : > { %v364_v43 = vsub.f32 %v1240_v0, %v1419_v37  ;;  %v365_v45 = vsub.f32 %v1243_v1, %v1419_v37 }
  0x9f   : > { %v271_v48 = vpop.xlane.xlu0 %270  ;;  %v368_v49 = vsub.f32 %v1246_v2, %v1421_v41  ;;  %v369_v51 = vsub.f32 %v1251_v4, %v1421_v41 }
  0xa0   : > { %v1431_v53 = vmul.f32 0.0051020407, %v271_v48  ;;  %v279_v56 = vpop.xlane.xlu1 %278  ;;  %v404_v57 = vmul.f32 %v364_v43, %v364_v43  ;;  %v405_v59 = vmul.f32 %v365_v45, %v365_v45 }
  0xa1   : > { %v1433_v61 = vmul.f32 0.0051020407, %v279_v56  ;;  %v408_v3 = vmul.f32 %v368_v49, %v368_v49  ;;  %v409_v7 = vmul.f32 %v369_v51, %v369_v51 }
  0xa2   : > { %v444_v0 = vsel %vm263_vm0, %v405_v59, 0.0  ;;  %v366_v1 = vsub.f32 %v1254_v5, %v1431_v53  ;;  %v367_v2 = vsub.f32 %v1257_v6, %v1431_v53 }
  0xa3   : > { %v283_v9 = vpop.xlane.xlu0 %282  ;;  %v445_v13 = vadd.f32 %v444_v0, %v404_v57  ;;  %v452_v4 = vsel %vm263_vm0, %v409_v7, 0.0  ;;  %v370_v19 = vsub.f32 %v1265_v10, %v1433_v61  ;;  %v371_v21 = vsub.f32 %v1268_v11, %v1433_v61 }
  0xa4   : > { %v1445_v25 = vmul.f32 0.0051020407, %v283_v9  ;;  %v287_v29 = vpop.xlane.xlu1 %286  ;;  %v406_v32 = vmul.f32 %v366_v1, %v366_v1  ;;  %v407_v33 = vmul.f32 %v367_v2, %v367_v2  ;;  %v453_v35 = vadd.f32 %v452_v4, %v408_v3 }
  0xa5   : > { %446 = vadd.xlane.f32.xlu0 %v445_v13  ;;  %v1447_v5 = vmul.f32 0.0051020407, %v287_v29  ;;  %v410_v6 = vmul.f32 %v370_v19, %v370_v19  ;;  %v411_v40 = vmul.f32 %v371_v21, %v371_v21 }
  0xa6   : > { %v448_v43 = vsel %vm263_vm0, %v407_v33, 0.0  ;;  %v372_v45 = vsub.f32 %v1282_v18, %v1445_v25  ;;  %v373_v10 = vsub.f32 %v1274_v14, %v1445_v25 }
  0xa7   : > { %v291_v11 = vpop.xlane.xlu0 %290  ;;  %v449_v48 = vadd.f32 %v448_v43, %v406_v32  ;;  %v456_v49 = vsel %vm263_vm0, %v411_v40, 0.0  ;;  %v374_v51 = vsub.f32 %v1287_v20, %v1447_v5  ;;  %v375_v56 = vsub.f32 %v1277_v15, %v1447_v5 }
  0xa8   : > { %v1459_v57 = vmul.f32 0.0051020407, %v291_v11  ;;  %v295_v59 = vpop.xlane.xlu1 %294  ;;  %v412_v3 = vmul.f32 %v372_v45, %v372_v45  ;;  %v413_v7 = vmul.f32 %v373_v10, %v373_v10  ;;  %v457_v14 = vadd.f32 %v456_v49, %v410_v6 }
  0xa9   : > { %454 = vadd.xlane.f32.xlu0 %v453_v35  ;;  %450 = vadd.xlane.f32.xlu1 %v449_v48  ;;  %v1461_v18 = vmul.f32 0.0051020407, %v295_v59  ;;  %v414_v0 = vmul.f32 %v374_v51, %v374_v51  ;;  %v415_v1 = vmul.f32 %v375_v56, %v375_v56 }
  0xaa   : > { %v460_v2 = vsel %vm263_vm0, %v413_v7, 0.0  ;;  %v376_v20 = vsub.f32 %v1300_v26, %v1459_v57  ;;  %v377_v15 = vsub.f32 %v1292_v22, %v1459_v57 }
  0xab   : > { %v299_v9 = vpop.xlane.xlu0 %298  ;;  %v461_v13 = vadd.f32 %v460_v2, %v412_v3  ;;  %v464_v4 = vsel %vm263_vm0, %v415_v1, 0.0  ;;  %v378_v19 = vsub.f32 %v1305_v28, %v1461_v18  ;;  %v379_v21 = vsub.f32 %v1295_v23, %v1461_v18 }
  0xac   : > { %v1473_v29 = vmul.f32 0.0051020407, %v299_v9  ;;  %v303_v32 = vpop.xlane.xlu1 %302  ;;  %v416_v33 = vmul.f32 %v376_v20, %v376_v20  ;;  %v417_v35 = vmul.f32 %v377_v15, %v377_v15  ;;  %v465_v22 = vadd.f32 %v464_v4, %v414_v0 }
  0xad   : > { %458 = vadd.xlane.f32.xlu1 %v457_v14  ;;  %462 = vadd.xlane.f32.xlu0 %v461_v13  ;;  %v1475_v26 = vmul.f32 0.0051020407, %v303_v32  ;;  %v418_v6 = vmul.f32 %v378_v19, %v378_v19  ;;  %v419_v40 = vmul.f32 %v379_v21, %v379_v21 }
  0xae   : > { %v468_v43 = vsel %vm263_vm0, %v417_v35, 0.0  ;;  %v380_v28 = vsub.f32 %v1318_v34, %v1473_v29  ;;  %v381_v23 = vsub.f32 %v1310_v30, %v1473_v29 }
  0xaf   : > { %v307_v45 = vpop.xlane.xlu0 %306  ;;  %v469_v10 = vadd.f32 %v468_v43, %v416_v33  ;;  %v472_v11 = vsel %vm263_vm0, %v419_v40, 0.0  ;;  %v382_v48 = vsub.f32 %v1323_v36, %v1475_v26  ;;  %v383_v49 = vsub.f32 %v1313_v31, %v1475_v26 }
  0xb0   : > { %v1487_v51 = vmul.f32 0.0051020407, %v307_v45  ;;  %v311_v56 = vpop.xlane.xlu1 %310  ;;  %v420_v59 = vmul.f32 %v380_v28, %v380_v28  ;;  %v421_v3 = vmul.f32 %v381_v23, %v381_v23  ;;  %v473_v30 = vadd.f32 %v472_v11, %v418_v6 }
  0xb1   : > { %466 = vadd.xlane.f32.xlu1 %v465_v22  ;;  %470 = vadd.xlane.f32.xlu0 %v469_v10  ;;  %v1489_v34 = vmul.f32 0.0051020407, %v311_v56  ;;  %v422_v7 = vmul.f32 %v382_v48, %v382_v48  ;;  %v423_v14 = vmul.f32 %v383_v49, %v383_v49 }
  0xb2   : > { %v476_v0 = vsel %vm263_vm0, %v421_v3, 0.0  ;;  %v384_v36 = vsub.f32 %v1336_v42, %v1487_v51  ;;  %v385_v31 = vsub.f32 %v1328_v38, %v1487_v51 }
  0xb3   : > { %v315_v1 = vpop.xlane.xlu0 %314  ;;  %v477_v2 = vadd.f32 %v476_v0, %v420_v59  ;;  %v480_v20 = vsel %vm263_vm0, %v423_v14, 0.0  ;;  %v386_v15 = vsub.f32 %v1341_v44, %v1489_v34  ;;  %v387_v9 = vsub.f32 %v1331_v39, %v1489_v34 }
  0xb4   : > { %v1501_v13 = vmul.f32 0.0051020407, %v315_v1  ;;  %v319_v4 = vpop.xlane.xlu1 %318  ;;  %v424_v19 = vmul.f32 %v384_v36, %v384_v36  ;;  %v425_v21 = vmul.f32 %v385_v31, %v385_v31  ;;  %v481_v38 = vadd.f32 %v480_v20, %v422_v7 }
  0xb5   : > { %474 = vadd.xlane.f32.xlu1 %v473_v30  ;;  %478 = vadd.xlane.f32.xlu0 %v477_v2  ;;  %v1503_v42 = vmul.f32 0.0051020407, %v319_v4  ;;  %v426_v32 = vmul.f32 %v386_v15, %v386_v15  ;;  %v427_v33 = vmul.f32 %v387_v9, %v387_v9 }
  0xb6   : > { %v484_v35 = vsel %vm263_vm0, %v425_v21, 0.0  ;;  %v388_v44 = vsub.f32 %v1354_v50, %v1501_v13  ;;  %v389_v39 = vsub.f32 %v1346_v46, %v1501_v13 }
  0xb7   : > { %v323_v22 = vpop.xlane.xlu0 %322  ;;  %v485_v6 = vadd.f32 %v484_v35, %v424_v19  ;;  %v488_v40 = vsel %vm263_vm0, %v427_v33, 0.0  ;;  %v390_v43 = vsub.f32 %v1359_v52, %v1503_v42  ;;  %v391_v28 = vsub.f32 %v1349_v47, %v1503_v42 }
  0xb8   : > { %v1515_v23 = vmul.f32 0.0051020407, %v323_v22  ;;  %v327_v45 = vpop.xlane.xlu1 %326  ;;  %v428_v10 = vmul.f32 %v388_v44, %v388_v44  ;;  %v429_v11 = vmul.f32 %v389_v39, %v389_v39  ;;  %v489_v46 = vadd.f32 %v488_v40, %v426_v32 }
  0xb9   : > { %482 = vadd.xlane.f32.xlu1 %v481_v38  ;;  %486 = vadd.xlane.f32.xlu0 %v485_v6  ;;  %v1517_v50 = vmul.f32 0.0051020407, %v327_v45  ;;  %v430_v48 = vmul.f32 %v390_v43, %v390_v43  ;;  %v431_v49 = vmul.f32 %v391_v28, %v391_v28 }
  0xba   : > { %v492_v56 = vsel %vm263_vm0, %v429_v11, 0.0  ;;  %v392_v52 = vsub.f32 %v1372_v58, %v1515_v23  ;;  %v393_v47 = vsub.f32 %v1364_v54, %v1515_v23 }
  0xbb   : > { %v331_v59 = vpop.xlane.xlu0 %330  ;;  %v493_v3 = vadd.f32 %v492_v56, %v428_v10  ;;  %v496_v30 = vsel %vm263_vm0, %v431_v49, 0.0  ;;  %v394_v7 = vsub.f32 %v1377_v60, %v1517_v50  ;;  %v395_v14 = vsub.f32 %v1367_v55, %v1517_v50 }
  0xbc   : > { %v1529_v0 = vmul.f32 0.0051020407, %v331_v59  ;;  %v335_v36 = vpop.xlane.xlu1 %334  ;;  %v432_v31 = vmul.f32 %v392_v52, %v392_v52  ;;  %v433_v1 = vmul.f32 %v393_v47, %v393_v47  ;;  %v497_v54 = vadd.f32 %v496_v30, %v430_v48 }
  0xbd   : > { %490 = vadd.xlane.f32.xlu1 %v489_v46  ;;  %494 = vadd.xlane.f32.xlu0 %v493_v3  ;;  %v1531_v58 = vmul.f32 0.0051020407, %v335_v36  ;;  %v434_v2 = vmul.f32 %v394_v7, %v394_v7  ;;  %v435_v20 = vmul.f32 %v395_v14, %v395_v14  ;;  %v1200_v10 = vmov 0  }
  0xbe   : > { %v500_v15 = vsel %vm263_vm0, %v433_v1, 0.0  ;;  %v396_v60 = vsub.f32 %v1390_v8, %v1529_v0  ;;  %v397_v55 = vsub.f32 %v1382_v62, %v1529_v0  ;;  %1110 = vset.pattern.permute.xlu0 %v1200_v10  ;;  %1111 = vset.pattern.permute.xlu1 %v1200_v10 }
  0xbf   : > { %v339_v9 = vpop.xlane.xlu0 %338  ;;  %v501_v4 = vadd.f32 %v500_v15, %v432_v31  ;;  %v504_v19 = vsel %vm263_vm0, %v435_v20, 0.0  ;;  %v398_v21 = vsub.f32 %v1395_v12, %v1531_v58  ;;  %v399_v38 = vsub.f32 %v1385_v63, %v1531_v58 }
  0xc0   : > { %v1543_v32 = vmul.f32 0.0051020407, %v339_v9  ;;  %v343_v33 = vpop.xlane.xlu1 %342  ;;  %v436_v35 = vmul.f32 %v396_v60, %v396_v60  ;;  %v437_v44 = vmul.f32 %v397_v55, %v397_v55  ;;  %v505_v62 = vadd.f32 %v504_v19, %v434_v2 }
  0xc1   : > { %498 = vadd.xlane.f32.xlu1 %v497_v54  ;;  %502 = vadd.xlane.f32.xlu0 %v501_v4  ;;  %v1545_v8 = vmul.f32 0.0051020407, %v343_v33  ;;  %v438_v39 = vmul.f32 %v398_v21, %v398_v21  ;;  %v439_v22 = vmul.f32 %v399_v38, %v399_v38  ;;  %v584_v38 = vld [vmem:[%s1565_s22] sm:$0xff] }
  0xc2   : > { %v508_v6 = vsel %vm263_vm0, %v437_v44, 0.0  ;;  %v400_v12 = vsub.f32 %v1408_v24, %v1543_v32  ;;  %v401_v63 = vsub.f32 %v1400_v16, %v1543_v32 }
  0xc3   : > { %v509_v40 = vadd.f32 %v508_v6, %v436_v35  ;;  %v512_v43 = vsel %vm263_vm0, %v439_v22, 0.0  ;;  %v402_v28 = vsub.f32 %v1413_v27, %v1545_v8  ;;  %v403_v45 = vsub.f32 %v1403_v17, %v1545_v8  ;;  %v585_v6 = vld [vmem:[%s1565_s22 + $0x8] sm:$0xff] }
  0xc4   : > { %v440_v11 = vmul.f32 %v400_v12, %v400_v12  ;;  %v441_v46 = vmul.f32 %v401_v63, %v401_v63  ;;  %v513_v24 = vadd.f32 %v512_v43, %v438_v39 }
  0xc5   : > { %506 = vadd.xlane.f32.xlu1 %v505_v62  ;;  %510 = vadd.xlane.f32.xlu0 %v509_v40  ;;  %v442_v48 = vmul.f32 %v402_v28, %v402_v28  ;;  %v443_v49 = vmul.f32 %v403_v45, %v403_v45 }
  0xc6   : > { %v516_v16 = vsel %vm263_vm0, %v441_v46, 0.0  ;;  %v586_v46 = vld [vmem:[%s1565_s22 + $0x10] sm:$0xff] }
  0xc7   : > { %v517_v56 = vadd.f32 %v516_v16, %v440_v11  ;;  %v520_v52 = vsel %vm263_vm0, %v443_v49, 0.0 }
  0xc8   : > { %v521_v27 = vadd.f32 %v520_v52, %v442_v48 }
  0xc9   : > { %514 = vadd.xlane.f32.xlu1 %v513_v24  ;;  %518 = vadd.xlane.f32.xlu0 %v517_v56 }
  0xcd   : > { %522 = vadd.xlane.f32.xlu1 %v521_v27 }
 0x12e   : > { %v447_v17 = vpop.xlane.xlu0 %446 }
 0x12f   : > { %v524_v47 = vmul.f32 0.0051020407, %v447_v17 }
 0x131   : > { %v544_v59 = vadd.f32 1e-05, %v524_v47  ;;  %v587_v47 = vld [vmem:[%s1565_s22 + $0x18] sm:$0xff] }
 0x132   : > { %v451_v3 = vpop.xlane.xlu1 %450  ;;  %v455_v30 = vpop.xlane.xlu0 %454 }
 0x133   : > { %1112 = vrsqrt.f32 %v544_v59  ;;  %v525_v7 = vmul.f32 0.0051020407, %v451_v3  ;;  %v526_v14 = vmul.f32 0.0051020407, %v455_v30 }
 0x135   : > { %v545_v36 = vadd.f32 1e-05, %v525_v7  ;;  %v546_v31 = vadd.f32 1e-05, %v526_v14 }
 0x136   : > { %v459_v1 = vpop.xlane.xlu1 %458  ;;  %v463_v54 = vpop.xlane.xlu0 %462 }
 0x137   : > { %1114 = vrsqrt.f32 %v545_v36  ;;  %v527_v2 = vmul.f32 0.0051020407, %v459_v1  ;;  %v528_v15 = vmul.f32 0.0051020407, %v463_v54  ;;  %v588_v54 = vld [vmem:[%s1565_s22 + $0x20] sm:$0xff] }
 0x138   : > { %1116 = vrsqrt.f32 %v546_v31 }
 0x139   : > { %v547_v20 = vadd.f32 1e-05, %v527_v2  ;;  %v548_v9 = vadd.f32 1e-05, %v528_v15 }
 0x13a   : > { %v467_v60 = vpop.xlane.xlu1 %466  ;;  %v471_v55 = vpop.xlane.xlu0 %470 }
 0x13b   : > { %1118 = vrsqrt.f32 %v547_v20  ;;  %v529_v4 = vmul.f32 0.0051020407, %v467_v60  ;;  %v530_v35 = vmul.f32 0.0051020407, %v471_v55 }
 0x13c   : > { %1120 = vrsqrt.f32 %v548_v9 }
 0x13d   : > { %v549_v44 = vadd.f32 1e-05, %v529_v4  ;;  %v550_v40 = vadd.f32 1e-05, %v530_v35 }
 0x13e   : > { %v475_v19 = vpop.xlane.xlu1 %474  ;;  %v479_v21 = vpop.xlane.xlu0 %478 }
 0x13f   : > { %1122 = vrsqrt.f32 %v549_v44  ;;  %v531_v43 = vmul.f32 0.0051020407, %v475_v19  ;;  %v532_v48 = vmul.f32 0.0051020407, %v479_v21  ;;  %v593_v19 = vld [vmem:[%s1565_s22 + $0x48] sm:$0xff] }
 0x140   : > { %v1113_v33 = vpop.eup %1112  ;;  %v589_v21 = vld [vmem:[%s1565_s22 + $0x28] sm:$0xff] }
 0x141   : > { %v1568_v62 = vmul.f32 %v1113_v33, %v584_v38  ;;  %v551_v16 = vadd.f32 1e-05, %v531_v43  ;;  %v552_v3 = vadd.f32 1e-05, %v532_v48  ;;  %v595_v43 = vld [vmem:[%s1565_s22 + $0x58] sm:$0xff] }
 0x142   : > { %v483_v39 = vpop.xlane.xlu1 %482  ;;  %v487_v22 = vpop.xlane.xlu0 %486 }
 0x143   : > { %v533_v12 = vmul.f32 0.0051020407, %v483_v39  ;;  %686 = vperm.xlu0 %1110, %v1568_v62   ;;  %v534_v30 = vmul.f32 0.0051020407, %v487_v22 }
 0x144   : > { %v1115_v63 = vpop.eup %1114 }
 0x145   : > { %v553_v28 = vadd.f32 1e-05, %v533_v12  ;;  %v1572_v45 = vmul.f32 %v1115_v63, %v585_v6  ;;  %v1117_v10 = vpop.eup %1116  ;;  %v554_v15 = vadd.f32 1e-05, %v534_v30 }
 0x146   : > { %v491_v11 = vpop.xlane.xlu1 %490  ;;  %v495_v49 = vpop.xlane.xlu0 %494  ;;  %v1576_v52 = vmul.f32 %v1117_v10, %v586_v46 }
 0x147   : > { %1124 = vrsqrt.f32 %v553_v28  ;;  %v535_v24 = vmul.f32 0.0051020407, %v491_v11  ;;  %691 = vperm.xlu1 %1111, %v1572_v45   ;;  %v536_v20 = vmul.f32 0.0051020407, %v495_v49  ;;  %v590_v28 = vld [vmem:[%s1565_s22 + $0x30] sm:$0xff] }
 0x148   : > { %1126 = vrsqrt.f32 %v550_v40  ;;  %v1119_v27 = vpop.eup %1118 }
 0x149   : > { %v555_v56 = vadd.f32 1e-05, %v535_v24  ;;  %v1580_v14 = vmul.f32 %v1119_v27, %v587_v47  ;;  %v1121_v36 = vpop.eup %1120  ;;  %v556_v35 = vadd.f32 1e-05, %v536_v20  ;;  %v591_v47 = vld [vmem:[%s1565_s22 + $0x38] sm:$0xff] }
 0x14a   : > { %v499_v17 = vpop.xlane.xlu1 %498  ;;  %v503_v31 = vpop.xlane.xlu0 %502  ;;  %v1584_v55 = vmul.f32 %v1121_v36, %v588_v54  ;;  %v592_v54 = vld [vmem:[%s1565_s22 + $0x40] sm:$0xff] }
 0x14b   : > { %1128 = vrsqrt.f32 %v555_v56  ;;  %v537_v59 = vmul.f32 0.0051020407, %v499_v17  ;;  %696 = vperm.xlu1 %1111, %v1576_v52   ;;  %v538_v44 = vmul.f32 0.0051020407, %v503_v31  ;;  %v597_v17 = vld [vmem:[%s1565_s22 + $0x68] sm:$0xff] }
 0x14c   : > { %1130 = vrsqrt.f32 %v551_v16  ;;  %v1123_v9 = vpop.eup %1122 }
 0x14d   : > { %v557_v7 = vadd.f32 1e-05, %v537_v59  ;;  %v1591_v12 = vmul.f32 %v1123_v9, %v589_v21  ;;  %v558_v46 = vadd.f32 1e-05, %v538_v44  ;;  %v603_v44 = vld [vmem:[%s1565_s22 + $0x98] sm:$0xff] }
 0x14e   : > { %v507_v1 = vpop.xlane.xlu1 %506  ;;  %v511_v39 = vpop.xlane.xlu0 %510 }
 0x14f   : > { %1132 = vrsqrt.f32 %v557_v7  ;;  %v539_v2 = vmul.f32 0.0051020407, %v507_v1  ;;  %701 = vperm.xlu1 %1111, %v1580_v14   ;;  %v540_v24 = vmul.f32 0.0051020407, %v511_v39  ;;  %v599_v1 = vld [vmem:[%s1565_s22 + $0x78] sm:$0xff]  ;;  %v596_v39 = vld [vmem:[%s1565_s22 + $0x60] sm:$0xff] }
 0x150   : > { %1134 = vrsqrt.f32 %v552_v3 }
 0x151   : > { %v559_v60 = vadd.f32 1e-05, %v539_v2  ;;  %v560_v3 = vadd.f32 1e-05, %v540_v24 }
 0x152   : > { %v515_v4 = vpop.xlane.xlu1 %514  ;;  %v519_v27 = vpop.xlane.xlu0 %518 }
 0x153   : > { %1136 = vrsqrt.f32 %v559_v60  ;;  %v541_v38 = vmul.f32 0.0051020407, %v515_v4  ;;  %706 = vperm.xlu1 %1111, %v1584_v55   ;;  %v542_v30 = vmul.f32 0.0051020407, %v519_v27  ;;  %v601_v4 = vld [vmem:[%s1565_s22 + $0x88] sm:$0xff]  ;;  %v627_v27 = vld [vmem:[%s1635_s25 + $0x18] sm:$0xff] }
 0x154   : > { %v1125_v33 = vpop.eup %1124  ;;  %1138 = vrsqrt.f32 %v554_v15 }
 0x155   : > { %v561_v22 = vadd.f32 1e-05, %v541_v38  ;;  %v1589_v6 = vmul.f32 %v1125_v33, %v593_v19  ;;  %v1127_v63 = vpop.eup %1126  ;;  %v562_v20 = vadd.f32 1e-05, %v542_v30  ;;  %v594_v19 = vld [vmem:[%s1565_s22 + $0x50] sm:$0xff] }
 0x156   : > { %v523_v40 = vpop.xlane.xlu1 %522  ;;  %v1599_v16 = vmul.f32 %v1127_v63, %v590_v28  ;;  %v645_v28 = vmul.f32 %v1572_v45, %v1431_v53  ;;  %v602_v30 = vld [vmem:[%s1565_s22 + $0x90] sm:$0xff] }
 0x157   : > { %1140 = vrsqrt.f32 %v561_v22  ;;  %v543_v10 = vmul.f32 0.0051020407, %v523_v40  ;;  %731 = vperm.xlu0 %1110, %v1589_v6   ;;  %711 = vperm.xlu1 %1111, %v1591_v12  }
 0x158   : > { %v1129_v11 = vpop.eup %1128  ;;  %1142 = vrsqrt.f32 %v556_v35 }
 0x159   : > { %v563_v48 = vadd.f32 1e-05, %v543_v10  ;;  %v1597_v49 = vmul.f32 %v1129_v11, %v595_v43  ;;  %v1131_v56 = vpop.eup %1130  ;;  %v625_v10 = vld [vmem:[%s1635_s25 + $0x8] sm:$0xff]  ;;  %v598_v11 = vld [vmem:[%s1565_s22 + $0x70] sm:$0xff] }
 0x15a   : > { %v611_v36 = vmul.f32 %v1131_v56, %v591_v47  ;;  %v649_v47 = vmul.f32 %v1591_v12, %v1447_v5 }
 0x15b   : > { %1144 = vrsqrt.f32 %v563_v48  ;;  %741 = vperm.xlu0 %1110, %v1597_v49   ;;  %716 = vperm.xlu1 %1111, %v1599_v16   ;;  %v647_v48 = vmul.f32 %v1580_v14, %v1433_v61 }
 0x15c   : > { %v1133_v59 = vpop.eup %1132  ;;  %1146 = vrsqrt.f32 %v558_v46  ;;  %v665_v46 = vsub.f32 %v625_v10, %v645_v28  ;;  %v641_v28 = vld [vmem:[%s1635_s25 + $0x88] sm:$0xff] }
 0x15d   : > { %v1605_v7 = vmul.f32 %v1133_v59, %v597_v17  ;;  %v1135_v31 = vpop.eup %1134  ;;  %1148 = vrsqrt.f32 %v560_v3  ;;  %v600_v17 = vld [vmem:[%s1565_s22 + $0x80] sm:$0xff]  ;;  %v667_v53 = vsub.f32 %v627_v27, %v647_v48  ;;  %v629_v3 = vld [vmem:[%s1635_s25 + $0x28] sm:$0xff] }
 0x15e   : > { %v1612_v60 = vmul.f32 %v1135_v31, %v592_v54  ;;  %1150 = vrsqrt.f32 %v562_v20  ;;  %v669_v61 = vsub.f32 %v629_v3, %v649_v47  ;;  %v651_v31 = vmul.f32 %v611_v36, %v1461_v18  ;;  %v631_v54 = vld [vmem:[%s1635_s25 + $0x38] sm:$0xff]  ;;  %v626_v18 = vld [vmem:[%s1635_s25 + $0x10] sm:$0xff] }
 0x15f   : > { %751 = vperm.xlu0 %1110, %v1605_v7   ;;  %721 = vperm.xlu1 %1111, %v611_v36   ;;  %v653_v20 = vmul.f32 %v1589_v6, %v1475_v26  ;;  %v655_v36 = vmul.f32 %v1597_v49, %v1489_v34  ;;  %v628_v26 = vld [vmem:[%s1635_s25 + $0x20] sm:$0xff]  ;;  %v657_v6 = vmul.f32 %v1605_v7, %v1503_v42  ;;  %v630_v34 = vld [vmem:[%s1635_s25 + $0x30] sm:$0xff] }
 0x160   : > { %v1137_v2 = vpop.eup %1136  ;;  %v671_v5 = vsub.f32 %v631_v54, %v651_v31  ;;  %v632_v42 = vld [vmem:[%s1635_s25 + $0x40] sm:$0xff] }
 0x161   : > { %v1610_v15 = vmul.f32 %v1137_v2, %v599_v1  ;;  %v1139_v9 = vpop.eup %1138  ;;  %v644_v1 = vmul.f32 %v1568_v62, %v1419_v37  ;;  %v624_v2 = vld [vmem:[%s1635_s25] sm:$0xff] }
 0x162   : > { %v1620_v35 = vmul.f32 %v1139_v9, %v594_v19  ;;  %v646_v9 = vmul.f32 %v1576_v52, %v1421_v41  ;;  %v648_v19 = vmul.f32 %v1584_v55, %v1445_v25 }
 0x163   : > { %761 = vperm.xlu0 %1110, %v1610_v15   ;;  %726 = vperm.xlu1 %1111, %v1612_v60   ;;  %v664_v12 = vsub.f32 %v624_v2, %v644_v1  ;;  %v659_v49 = vmul.f32 %v1610_v15, %v1517_v50  ;;  %v634_v50 = vld [vmem:[%s1635_s25 + $0x50] sm:$0xff] }
 0x164   : > { %v1141_v21 = vpop.eup %1140  ;;  %v666_v62 = vsub.f32 %v626_v18, %v646_v9  ;;  %v668_v52 = vsub.f32 %v628_v26, %v648_v19 }
 0x165   : > { %v1143_v38 = vpop.eup %1142  ;;  %v1618_v33 = vmul.f32 %v1141_v21, %v601_v4  ;;  %v633_v4 = vld [vmem:[%s1635_s25 + $0x48] sm:$0xff]  ;;  %v635_v21 = vld [vmem:[%s1635_s25 + $0x58] sm:$0xff] }
 0x166   : > { %v1628_v43 = vmul.f32 %v1143_v38, %v596_v39  ;;  %v673_v37 = vsub.f32 %v633_v4, %v653_v20  ;;  %v675_v41 = vsub.f32 %v635_v21, %v655_v36  ;;  %v650_v38 = vmul.f32 %v1599_v16, %v1459_v57  ;;  %v1153_v20 = vld [vmem:[%s1237_s18 + $0x18] sm:$0xff]  ;;  %v1154_v36 = vld [vmem:[%s1237_s18 + $0x30] sm:$0xff] }
 0x167   : > { %771 = vperm.xlu0 %1110, %v1618_v33   ;;  %736 = vperm.xlu1 %1111, %v1620_v35   ;;  %v652_v39 = vmul.f32 %v1612_v60, %v1473_v29  ;;  %v661_v7 = vmul.f32 %v1618_v33, %v1531_v58  ;;  %v636_v58 = vld [vmem:[%s1635_s25 + $0x60] sm:$0xff]  ;;  %v1155_v21 = vld [vmem:[%s1237_s18 + $0x38] sm:$0xff] }
 0x168   : > { %v1145_v22 = vpop.eup %1144  ;;  %v670_v55 = vsub.f32 %v630_v34, %v650_v38  ;;  %v656_v10 = vmul.f32 %v1628_v43, %v1501_v13 }
 0x169   : > { %v1147_v63 = vpop.eup %1146  ;;  %v1626_v40 = vmul.f32 %v1145_v22, %v603_v44  ;;  %v637_v44 = vld [vmem:[%s1635_s25 + $0x68] sm:$0xff]  ;;  %v639_v22 = vld [vmem:[%s1635_s25 + $0x78] sm:$0xff]  ;;  %v672_v16 = vsub.f32 %v632_v42, %v652_v39  ;;  %v681_v29 = vsub.f32 %v641_v28, %v661_v7  ;;  %v1160_v28 = vld [vmem:[%s1237_s18 + $0x70] sm:$0xff] }
 0x16a   : > { %v1643_v24 = vmul.f32 %v1147_v63, %v598_v11  ;;  %v1149_v56 = vpop.eup %1148  ;;  %v677_v25 = vsub.f32 %v637_v44, %v657_v6  ;;  %v679_v57 = vsub.f32 %v639_v22, %v659_v49  ;;  %v654_v63 = vmul.f32 %v1620_v35, %v1487_v51  ;;  %v643_v11 = vld [vmem:[%s1635_s25 + $0x98] sm:$0xff]  ;;  %v1156_v44 = vld [vmem:[%s1237_s18 + $0x50] sm:$0xff]  ;;  %v1159_v7 = vld [vmem:[%s1237_s18 + $0x8] sm:$0xff] }
 0x16b   : > { %781 = vperm.xlu0 %1110, %v1626_v40   ;;  %746 = vperm.xlu1 %1111, %v1628_v43   ;;  %v1650_v45 = vmul.f32 %v1149_v56, %v600_v17  ;;  %v1151_v59 = vpop.eup %1150  ;;  %v663_v60 = vmul.f32 %v1626_v40, %v1545_v8  ;;  %v676_v33 = vsub.f32 %v636_v58, %v656_v10  ;;  %v640_v40 = vld [vmem:[%s1635_s25 + $0x80] sm:$0xff]  ;;  %v642_v56 = vld [vmem:[%s1635_s25 + $0x90] sm:$0xff] }
 0x16c   : > { %v1657_v14 = vmul.f32 %v1151_v59, %v602_v30  ;;  %v674_v15 = vsub.f32 %v634_v50, %v654_v63  ;;  %v658_v35 = vmul.f32 %v1643_v24, %v1515_v23 }
 0x16d   : > { %v683_v51 = vsub.f32 %v643_v11, %v663_v60  ;;  %v660_v8 = vmul.f32 %v1650_v45, %v1529_v0 }
 0x16e   : > { %v662_v43 = vmul.f32 %v1657_v14, %v1543_v32 }
 0x16f   : > { %831 = vperm.xlu0 %1110, %v665_v46   ;;  %756 = vperm.xlu1 %1111, %v1643_v24   ;;  %v638_v46 = vld [vmem:[%s1635_s25 + $0x70] sm:$0xff]  ;;  %v680_v13 = vsub.f32 %v640_v40, %v660_v8 }
 0x170   : > { %v678_v48 = vsub.f32 %v638_v46, %v658_v35  ;;  %v682_v27 = vsub.f32 %v642_v56, %v662_v43  ;;  %v1162_v35 = vld [vmem:[%s1237_s18 + $0x20] sm:$0xff]  ;;  %v1164_v40 = vld [vmem:[%s1237_s18 + $0x90] sm:$0xff]  ;;  %v1165_v43 = vld [vmem:[%s1237_s18 + $0x98] sm:$0xff] }
 0x173   : > { %841 = vperm.xlu0 %1110, %v667_v53   ;;  %766 = vperm.xlu1 %1111, %v1650_v45  }
 0x177   : > { %851 = vperm.xlu0 %1110, %v669_v61   ;;  %776 = vperm.xlu1 %1111, %v1657_v14  }
 0x17b   : > { %861 = vperm.xlu0 %1110, %v671_v5   ;;  %826 = vperm.xlu1 %1111, %v664_v12   ;;  %v1152_v5 = vld [vmem:[%s1237_s18 + $0x10] sm:$0xff] }
 0x17f   : > { %871 = vperm.xlu0 %1110, %v673_v37   ;;  %836 = vperm.xlu1 %1111, %v666_v62  }
 0x183   : > { %881 = vperm.xlu0 %1110, %v675_v41   ;;  %846 = vperm.xlu1 %1111, %v668_v52  }
 0x187   : > { %891 = vperm.xlu0 %1110, %v677_v25   ;;  %856 = vperm.xlu1 %1111, %v670_v55   ;;  %v1157_v25 = vld [vmem:[%s1237_s18 + $0x58] sm:$0xff] }
 0x18b   : > { %901 = vperm.xlu0 %1110, %v679_v57   ;;  %866 = vperm.xlu1 %1111, %v672_v16   ;;  %v1158_v57 = vld [vmem:[%s1237_s18] sm:$0xff] }
 0x18f   : > { %911 = vperm.xlu0 %1110, %v681_v29   ;;  %876 = vperm.xlu1 %1111, %v674_v15   ;;  %v1161_v29 = vld [vmem:[%s1237_s18 + $0x78] sm:$0xff] }
 0x193   : > { %921 = vperm.xlu0 %1110, %v683_v51   ;;  %886 = vperm.xlu1 %1111, %v676_v33  }
 0x197   : > { %896 = vperm.xlu1 %1111, %v678_v48   ;;  %v1163_v48 = vld [vmem:[%s1237_s18 + $0x28] sm:$0xff] }
 0x19b   : > { %906 = vperm.xlu1 %1111, %v680_v13  }
 0x19f   : > { %916 = vperm.xlu1 %1111, %v682_v27  }
 0x1be   : > { %v687_v24 = vpop.permute.xlu0 %686 }
 0x1bf   : > { %v784_v16 = vmul.f32 %v1158_v57, %v687_v24  ;;  %v785_v63 = vmul.f32 %v1159_v7, %v687_v24  ;;  %v1174_v7 = vld [vmem:[%s1237_s18 + $0x80] sm:$0xff] }
 0x1c2   : > { %v692_v17 = vpop.permute.xlu1 %691 }
 0x1c3   : > { %v786_v12 = vmul.f32 %v1152_v5, %v692_v17  ;;  %v787_v9 = vmul.f32 %v1153_v20, %v692_v17  ;;  %v1167_v5 = vld [vmem:[%s1237_s18 + $0x48] sm:$0xff]  ;;  %v1168_v20 = vld [vmem:[%s1237_s18 + $0xb0] sm:$0xff] }
 0x1c6   : > { %v1710_v53 = vpop.permute.xlu1 %696 }
 0x1c7   : > { %v788_v46 = vmul.f32 %v1162_v35, %v1710_v53  ;;  %v789_v8 = vmul.f32 %v1163_v48, %v1710_v53  ;;  %v1178_v35 = vld [vmem:[%s1237_s18 + $0xa0] sm:$0xff] }
 0x1ca   : > { %v702_v23 = vpop.permute.xlu1 %701 }
 0x1cb   : > { %v790_v19 = vmul.f32 %v1154_v36, %v702_v23  ;;  %v791_v26 = vmul.f32 %v1155_v21, %v702_v23 }
 0x1ce   : > { %v1712_v47 = vpop.permute.xlu1 %706 }
 0x1d2   : > { %v712_v0 = vpop.permute.xlu1 %711  ;;  %v1714_v45 = vpop.permute.xlu0 %731 }
 0x1d3   : > { %v794_v34 = vmul.f32 %v1156_v44, %v712_v0  ;;  %v795_v55 = vmul.f32 %v1157_v25, %v712_v0  ;;  %v802_v13 = vmul.f32 %v1164_v40, %v1714_v45  ;;  %v803_v56 = vmul.f32 %v1165_v43, %v1714_v45  ;;  %v1172_v44 = vld [vmem:[%s1237_s18 + $0xd0] sm:$0xff]  ;;  %v1173_v25 = vld [vmem:[%s1237_s18 + $0xd8] sm:$0xff] }
 0x1d6   : > { %v1716_v59 = vpop.permute.xlu1 %716  ;;  %v1718_v32 = vpop.permute.xlu0 %741 }
 0x1da   : > { %v722_v3 = vpop.permute.xlu1 %721  ;;  %v1720_v30 = vpop.permute.xlu0 %751 }
 0x1db   : > { %v798_v50 = vmul.f32 %v1160_v28, %v722_v3  ;;  %v799_v15 = vmul.f32 %v1161_v29, %v722_v3  ;;  %v1166_v3 = vld [vmem:[%s1237_s18 + $0x40] sm:$0xff] }
 0x1dc   : > { %v792_v45 = vmul.f32 %v1166_v3, %v1712_v47 }
 0x1de   : > { %v1722_v61 = vpop.permute.xlu1 %726  ;;  %v1724_v14 = vpop.permute.xlu0 %761 }
 0x1e2   : > { %v1726_v31 = vpop.permute.xlu1 %736  ;;  %v1728_v1 = vpop.permute.xlu0 %771 }
 0x1e6   : > { %v1730_v54 = vpop.permute.xlu1 %746  ;;  %v1732_v2 = vpop.permute.xlu0 %781 }
 0x1ea   : > { %v1736_v4 = vpop.permute.xlu1 %756  ;;  %v832_v18 = vpop.permute.xlu0 %831 }
 0x1eb   : > { %v926_v37 = vadd.f32 %v832_v18, %v786_v12  ;;  %v927_v62 = vadd.f32 %v832_v18, %v787_v9  ;;  %v793_v12 = vmul.f32 %v1167_v5, %v1712_v47  ;;  %v806_v9 = vmul.f32 %v1168_v20, %v1718_v32  ;;  %v1169_v18 = vld [vmem:[%s1237_s18 + $0xb8] sm:$0xff] }
 0x1ed   : > { %966 = vst [vmem:[%s1743_s28 + $0x10] sm:$0xff] %v926_v37  ;;  %967 = vst.msk [vmem:[%s1743_s28 + $0x18] sm:$0xff] %vm263_vm0, %v927_v62  ;;  %v807_v37 = vmul.f32 %v1169_v18, %v1718_v32 }
 0x1ee   : > { %v1750_v41 = vpop.permute.xlu1 %766  ;;  %v842_v52 = vpop.permute.xlu0 %841 }
 0x1ef   : > { %v930_v6 = vadd.f32 %v842_v52, %v790_v19  ;;  %v931_v38 = vadd.f32 %v842_v52, %v791_v26  ;;  %v1170_v52 = vld [vmem:[%s1237_s18 + $0x60] sm:$0xff] }
 0x1f0   : > { %v796_v32 = vmul.f32 %v1170_v52, %v1716_v59 }
 0x1f1   : > { %970 = vst [vmem:[%s1743_s28 + $0x30] sm:$0xff] %v930_v6  ;;  %971 = vst.msk [vmem:[%s1743_s28 + $0x38] sm:$0xff] %vm263_vm0, %v931_v38  ;;  %v1171_v6 = vld [vmem:[%s1237_s18 + $0x68] sm:$0xff] }
 0x1f2   : > { %v1757_v49 = vpop.permute.xlu1 %776  ;;  %v852_v39 = vpop.permute.xlu0 %851  ;;  %v797_v38 = vmul.f32 %v1171_v6, %v1716_v59  ;;  %v1188_v6 = vld [vmem:[%s1237_s18 + $0x100] sm:$0xff] }
 0x1f3   : > { %v934_v22 = vadd.f32 %v852_v39, %v794_v34  ;;  %v935_v42 = vadd.f32 %v852_v39, %v795_v55  ;;  %v810_v34 = vmul.f32 %v1172_v44, %v1720_v30  ;;  %v811_v55 = vmul.f32 %v1173_v25, %v1720_v30  ;;  %v1189_v44 = vld [vmem:[%s1237_s18 + $0x108] sm:$0xff] }
 0x1f4   : > { %v800_v30 = vmul.f32 %v1174_v7, %v1722_v61 }
 0x1f5   : > { %974 = vst [vmem:[%s1743_s28 + $0x50] sm:$0xff] %v934_v22  ;;  %975 = vst.msk [vmem:[%s1743_s28 + $0x58] sm:$0xff] %vm263_vm0, %v935_v42 }
 0x1f6   : > { %v827_v60 = vpop.permute.xlu1 %826  ;;  %v862_v10 = vpop.permute.xlu0 %861 }
 0x1f7   : > { %v924_v11 = vadd.f32 %v827_v60, %v784_v16  ;;  %v925_v58 = vadd.f32 %v827_v60, %v785_v63  ;;  %v938_v51 = vadd.f32 %v862_v10, %v798_v50  ;;  %v939_v33 = vadd.f32 %v862_v10, %v799_v15  ;;  %v1175_v63 = vld [vmem:[%s1237_s18 + $0x88] sm:$0xff]  ;;  %v1176_v50 = vld [vmem:[%s1237_s18 + $0xf0] sm:$0xff]  ;;  %v1177_v15 = vld [vmem:[%s1237_s18 + $0xf8] sm:$0xff] }
 0x1f8   : > { %v801_v28 = vmul.f32 %v1175_v63, %v1722_v61  ;;  %v814_v29 = vmul.f32 %v1176_v50, %v1724_v14  ;;  %v815_v60 = vmul.f32 %v1177_v15, %v1724_v14  ;;  %v804_v14 = vmul.f32 %v1178_v35, %v1726_v31 }
 0x1f9   : > { %964 = vst [vmem:[%s1743_s28] sm:$0xff] %v924_v11  ;;  %965 = vst.msk [vmem:[%s1743_s28 + $0x8] sm:$0xff] %vm263_vm0, %v925_v58 }
 0x1fa   : > { %978 = vst [vmem:[%s1743_s28 + $0x70] sm:$0xff] %v938_v51  ;;  %979 = vst.msk [vmem:[%s1743_s28 + $0x78] sm:$0xff] %vm263_vm0, %v939_v33  ;;  %v837_v27 = vpop.permute.xlu1 %836  ;;  %v872_v17 = vpop.permute.xlu0 %871 }
 0x1fb   : > { %v928_v53 = vadd.f32 %v837_v27, %v788_v46  ;;  %v929_v23 = vadd.f32 %v837_v27, %v789_v8  ;;  %v942_v24 = vadd.f32 %v872_v17, %v802_v13  ;;  %v943_v0 = vadd.f32 %v872_v17, %v803_v56  ;;  %v1179_v46 = vld [vmem:[%s1237_s18 + $0xa8] sm:$0xff]  ;;  %v1180_v8 = vld [vmem:[%s1237_s18 + $0x110] sm:$0xff]  ;;  %v1181_v13 = vld [vmem:[%s1237_s18 + $0x118] sm:$0xff] }
 0x1fc   : > { %v805_v48 = vmul.f32 %v1179_v46, %v1726_v31  ;;  %v818_v40 = vmul.f32 %v1180_v8, %v1728_v1  ;;  %v819_v43 = vmul.f32 %v1181_v13, %v1728_v1 }
 0x1fd   : > { %968 = vst [vmem:[%s1743_s28 + $0x20] sm:$0xff] %v928_v53  ;;  %969 = vst.msk [vmem:[%s1743_s28 + $0x28] sm:$0xff] %vm263_vm0, %v929_v23 }
 0x1fe   : > { %982 = vst [vmem:[%s1743_s28 + $0x90] sm:$0xff] %v942_v24  ;;  %983 = vst.msk [vmem:[%s1743_s28 + $0x98] sm:$0xff] %vm263_vm0, %v943_v0  ;;  %v847_v62 = vpop.permute.xlu1 %846  ;;  %v882_v47 = vpop.permute.xlu0 %881  ;;  %v1182_v24 = vld [vmem:[%s1237_s18 + $0xc0] sm:$0xff]  ;;  %v1183_v0 = vld [vmem:[%s1237_s18 + $0xc8] sm:$0xff] }
 0x1ff   : > { %v932_v36 = vadd.f32 %v847_v62, %v792_v45  ;;  %v933_v19 = vadd.f32 %v847_v62, %v793_v12  ;;  %v946_v21 = vadd.f32 %v882_v47, %v806_v9  ;;  %v947_v26 = vadd.f32 %v882_v47, %v807_v37  ;;  %v1184_v45 = vld [vmem:[%s1237_s18 + $0x130] sm:$0xff]  ;;  %v1185_v12 = vld [vmem:[%s1237_s18 + $0x138] sm:$0xff] }
 0x200   : > { %v808_v1 = vmul.f32 %v1182_v24, %v1730_v54  ;;  %v809_v3 = vmul.f32 %v1183_v0, %v1730_v54  ;;  %v822_v5 = vmul.f32 %v1184_v45, %v1732_v2  ;;  %v823_v20 = vmul.f32 %v1185_v12, %v1732_v2 }
 0x201   : > { %972 = vst [vmem:[%s1743_s28 + $0x40] sm:$0xff] %v932_v36  ;;  %973 = vst.msk [vmem:[%s1743_s28 + $0x48] sm:$0xff] %vm263_vm0, %v933_v19  ;;  %v1186_v36 = vld [vmem:[%s1237_s18 + $0xe0] sm:$0xff]  ;;  %v1187_v19 = vld [vmem:[%s1237_s18 + $0xe8] sm:$0xff] }
 0x202   : > { %986 = vst [vmem:[%s1743_s28 + $0xb0] sm:$0xff] %v946_v21  ;;  %987 = vst.msk [vmem:[%s1743_s28 + $0xb8] sm:$0xff] %vm263_vm0, %v947_v26  ;;  %v857_v39 = vpop.permute.xlu1 %856  ;;  %v892_v59 = vpop.permute.xlu0 %891  ;;  %v812_v2 = vmul.f32 %v1186_v36, %v1736_v4  ;;  %v813_v21 = vmul.f32 %v1187_v19, %v1736_v4  ;;  %v817_v4 = vmul.f32 %v1189_v44, %v1750_v41 }
 0x203   : > { %v936_v22 = vadd.f32 %v857_v39, %v796_v32  ;;  %v937_v42 = vadd.f32 %v857_v39, %v797_v38  ;;  %v950_v57 = vadd.f32 %v892_v59, %v810_v34  ;;  %v951_v16 = vadd.f32 %v892_v59, %v811_v55  ;;  %v1190_v39 = vld [vmem:[%s1237_s18 + $0x120] sm:$0xff] }
 0x204   : > { %v816_v38 = vmul.f32 %v1188_v6, %v1750_v41  ;;  %v820_v59 = vmul.f32 %v1190_v39, %v1757_v49 }
 0x205   : > { %976 = vst [vmem:[%s1743_s28 + $0x60] sm:$0xff] %v936_v22  ;;  %977 = vst.msk [vmem:[%s1743_s28 + $0x68] sm:$0xff] %vm263_vm0, %v937_v42  ;;  %v1191_v22 = vld [vmem:[%s1237_s18 + $0x128] sm:$0xff] }
 0x206   : > { %990 = vst [vmem:[%s1743_s28 + $0xd0] sm:$0xff] %v950_v57  ;;  %991 = vst.msk [vmem:[%s1743_s28 + $0xd8] sm:$0xff] %vm263_vm0, %v951_v16  ;;  %v867_v10 = vpop.permute.xlu1 %866  ;;  %v902_v61 = vpop.permute.xlu0 %901  ;;  %v821_v42 = vmul.f32 %v1191_v22, %v1757_v49 }
 0x207   : > { %v940_v11 = vadd.f32 %v867_v10, %v800_v30  ;;  %v941_v58 = vadd.f32 %v867_v10, %v801_v28  ;;  %v954_v51 = vadd.f32 %v902_v61, %v814_v29  ;;  %v955_v33 = vadd.f32 %v902_v61, %v815_v60 }
 0x209   : > { %980 = vst [vmem:[%s1743_s28 + $0x80] sm:$0xff] %v940_v11  ;;  %981 = vst.msk [vmem:[%s1743_s28 + $0x88] sm:$0xff] %vm263_vm0, %v941_v58 }
 0x20a   : > { %994 = vst [vmem:[%s1743_s28 + $0xf0] sm:$0xff] %v954_v51  ;;  %995 = vst.msk [vmem:[%s1743_s28 + $0xf8] sm:$0xff] %vm263_vm0, %v955_v33  ;;  %v877_v56 = vpop.permute.xlu1 %876  ;;  %v912_v31 = vpop.permute.xlu0 %911 }
 0x20b   : > { %v944_v27 = vadd.f32 %v877_v56, %v804_v14  ;;  %v945_v17 = vadd.f32 %v877_v56, %v805_v48  ;;  %v958_v53 = vadd.f32 %v912_v31, %v818_v40  ;;  %v959_v23 = vadd.f32 %v912_v31, %v819_v43 }
 0x20d   : > { %984 = vst [vmem:[%s1743_s28 + $0xa0] sm:$0xff] %v944_v27  ;;  %985 = vst.msk [vmem:[%s1743_s28 + $0xa8] sm:$0xff] %vm263_vm0, %v945_v17 }
 0x20e   : > { %998 = vst [vmem:[%s1743_s28 + $0x110] sm:$0xff] %v958_v53  ;;  %999 = vst.msk [vmem:[%s1743_s28 + $0x118] sm:$0xff] %vm263_vm0, %v959_v23  ;;  %v887_v9 = vpop.permute.xlu1 %886  ;;  %v922_v18 = vpop.permute.xlu0 %921 }
 0x20f   : > { %v948_v54 = vadd.f32 %v887_v9, %v808_v1  ;;  %v949_v37 = vadd.f32 %v887_v9, %v809_v3  ;;  %v962_v62 = vadd.f32 %v922_v18, %v822_v5  ;;  %v963_v47 = vadd.f32 %v922_v18, %v823_v20 }
 0x211   : > { %988 = vst [vmem:[%s1743_s28 + $0xc0] sm:$0xff] %v948_v54  ;;  %989 = vst.msk [vmem:[%s1743_s28 + $0xc8] sm:$0xff] %vm263_vm0, %v949_v37 }
 0x212   : > { %1002 = vst [vmem:[%s1743_s28 + $0x130] sm:$0xff] %v962_v62  ;;  %1003 = vst.msk [vmem:[%s1743_s28 + $0x138] sm:$0xff] %vm263_vm0, %v963_v47  ;;  %v897_v26 = vpop.permute.xlu1 %896 }
 0x213   : > { %v952_v52 = vadd.f32 %v897_v26, %v812_v2  ;;  %v953_v32 = vadd.f32 %v897_v26, %v813_v21 }
 0x215   : > { %992 = vst [vmem:[%s1743_s28 + $0xe0] sm:$0xff] %v952_v52  ;;  %993 = vst.msk [vmem:[%s1743_s28 + $0xe8] sm:$0xff] %vm263_vm0, %v953_v32 }
 0x216   : > { %v907_v34 = vpop.permute.xlu1 %906 }
 0x217   : > { %v956_v25 = vadd.f32 %v907_v34, %v816_v38  ;;  %v957_v55 = vadd.f32 %v907_v34, %v817_v4 }
 0x219   : > { %996 = vst [vmem:[%s1743_s28 + $0x100] sm:$0xff] %v956_v25  ;;  %997 = vst.msk [vmem:[%s1743_s28 + $0x108] sm:$0xff] %vm263_vm0, %v957_v55 }
 0x21a   : > { %v917_v57 = vpop.permute.xlu1 %916 }
 0x21b   : > { %v960_v16 = vadd.f32 %v917_v57, %v820_v59  ;;  %v961_v7 = vadd.f32 %v917_v57, %v821_v42 }
 0x21d   : > { %1000 = vst [vmem:[%s1743_s28 + $0x120] sm:$0xff] %v960_v16  ;;  %1001 = vst.msk [vmem:[%s1743_s28 + $0x128] sm:$0xff] %vm263_vm0, %v961_v7 }
 0x21e PF: > { %s13_s12 = sadd.s32 1, %s1198_s12  }
 0x21f   : > { %p10_p4 = scmp.ge.s32.totalorder %s13_s12, 4  }
 0x221   :  { %12 = sbr.rel (!%p10_p4) target bundleno = 1 (0x1), region = 68 }

</bundles_post_ra>
